<compile_context>
chip_gen: v7x
topology: tpu7x:2x2x1
jax: 0.10.0
libtpu: 0.0.40
codegen_flags: <defaults>
</compile_context>

<pallas_src>
import functools

import jax
import jax.numpy as jnp
from jax.experimental import pallas as pl
from jax.experimental.pallas import tpu as pltpu


# ----------------------------------------------------------------------------
# Tiling helpers
# ----------------------------------------------------------------------------
def _round_up(x, m):
    return ((x + m - 1) // m) * m


def _m_tile_target():
    """512-row M tiles on 128 MiB-VMEM parts (v5e/v6e), 256 on v7x (64 MiB)."""
    try:
        vmem = pltpu.get_tpu_info().vmem_capacity_bytes
        return 512 if vmem >= 96 * 1024 * 1024 else 256
    except Exception:
        return 256


def _choose_m_tile(M, target=None):
    """Pick (tile, padded_M): large aligned tiles with bounded padding waste."""
    if target is None:
        target = _m_tile_target()
    if M <= target:
        mp = max(16, _round_up(M, 16))   # 16: safe sublane tile for bf16 output
        return mp, mp
    if _round_up(M, target) - M <= target // 2:
        return target, _round_up(M, target)
    return 128, _round_up(M, 128)


def _choose_n_tile(N, target=2048):
    for tn in (target, 1024, 512, 256, 128):
        if N % tn == 0:
            return tn
    return N   # ragged N: fall back to full-N blocks


# ----------------------------------------------------------------------------
# Pallas kernel 1: pairwise squared distance  dist[m, n] = ||q_m - x_n||^2
# (MXU cross term + VPU norms, bf16 output for the kNN ranking)
# ----------------------------------------------------------------------------
def _sqdist_kernel(q_ref, xt_ref, o_ref):
    q = q_ref[0]                                             # (tm, 3) f32
    xt = xt_ref[0]                                           # (3, tn) f32
    qn = jnp.sum(q * q, axis=-1, keepdims=True)              # (tm, 1)
    xn = jnp.sum(xt * xt, axis=0, keepdims=True)             # (1, tn)
    cross = jnp.dot(q.astype(jnp.bfloat16), xt.astype(jnp.bfloat16),
                    preferred_element_type=jnp.float32)      # (tm, tn) on MXU
    o_ref[0] = (qn - 2.0 * cross + xn).astype(jnp.bfloat16)


def pairwise_sqdist(key_points, vertices, tm):
    """key_points: (bs, Mp, 3) f32; vertices: (bs, 3, N) f32 -> (bs, Mp, N) bf16."""
    bs, Mp, _ = key_points.shape
    N = vertices.shape[2]
    tn = _choose_n_tile(N)
    grid = (bs, Mp // tm, N // tn)
    return pl.pallas_call(
        _sqdist_kernel,
        out_shape=jax.ShapeDtypeStruct((bs, Mp, N), jnp.bfloat16),
        grid=grid,
        in_specs=[pl.BlockSpec((1, tm, 3), lambda b, i, j: (b, i, 0)),
                  pl.BlockSpec((1, 3, tn), lambda b, i, j: (b, 0, j))],
        out_specs=pl.BlockSpec((1, tm, tn), lambda b, i, j: (b, i, j)),
        compiler_params=pltpu.CompilerParams(
            dimension_semantics=("parallel", "parallel", "parallel"),
            vmem_limit_bytes=32 * 1024 * 1024),
    )(key_points, vertices)


# ----------------------------------------------------------------------------
# Pallas kernel 2: pos_mlp + attn_mlp (K folded into matmul rows, bf16 MXU),
# softmax over neighbors and weighted pooling on a fused (tm, K, 3+C) stream,
# lane-dense transposed output block (3+C, tm).
# ----------------------------------------------------------------------------
def _pool_kernel(kp_ref, kf_ref, gp_ref, gf_ref,
                 w1_ref, w2_ref, w3_ref, w4_ref, bias_ref,
                 out_ref, *, k_valid):
    kp = kp_ref[0]                       # (tm, 3)     key points
    kf = kf_ref[0]                       # (tm, C)     key features
    gp = gp_ref[0]                       # (tm, K, 3)  grouped points
    gf = gf_ref[0]                       # (tm, K, C)  grouped features
    tm, K, _ = gp.shape
    C = gf.shape[2]

    w1 = w1_ref[...]                     # (3, 64)   bf16, BN folded in
    w2 = w2_ref[...]                     # (64, C)   bf16
    w3 = w3_ref[...]                     # (C, dim)  bf16, BN folded in
    w4 = w4_ref[...]                     # (dim, 3+C) bf16
    bias = bias_ref[...]                 # (4, Dmax) f32, packed biases
    d1 = w1.shape[1]
    dim = w3.shape[1]
    b1 = bias[0:1, :d1]
    b2 = bias[1:2, :C]
    b3 = bias[2:3, :dim]
    b4 = bias[3:4, :3 + C]

    # Fold K into the matmul row dimension: one MXU push per layer.
    pos_rel = (kp[:, None, :] - gp).reshape(tm * K, 3)
    qk_rel = (kf[:, None, :] - gf).reshape(tm * K, C)

    # pos_mlp: Conv(3->64)+BN+LeakyReLU(0.2)+Conv(64->C), BN folded into w1/b1.
    h = jnp.dot(pos_rel.astype(jnp.bfloat16), w1,
                preferred_element_type=jnp.float32) + b1
    h = jnp.maximum(h, 0.2 * h)                                 # LeakyReLU(0.2)
    pe = jnp.dot(h.astype(jnp.bfloat16), w2,
                 preferred_element_type=jnp.float32) + b2       # (tm*K, C)

    # attn_mlp on (qk_rel + pos_embedding); single (dim -> 3+C) output matmul.
    h2 = jnp.dot((qk_rel + pe).astype(jnp.bfloat16), w3,
                 preferred_element_type=jnp.float32) + b3
    h2 = jnp.maximum(h2, 0.2 * h2)
    sw = jnp.dot(h2.astype(jnp.bfloat16), w4,
                 preferred_element_type=jnp.float32) + b4       # (tm*K, 3+C)

    sw = sw.reshape(tm, K, 3 + C)
    pe = pe.reshape(tm, K, C)

    # Fused lane stream: [xyz | features + pos_embedding].
    vals = jnp.concatenate([gp, gf + pe], axis=-1)              # (tm, K, 3+C)

    # Mask padded neighbors (static branch; only compiled when K was padded).
    if k_valid < K:
        nb = jax.lax.broadcasted_iota(jnp.int32, (1, K, 1), 1)
        sw = jnp.where(nb < k_valid, sw, -1e30)

    # Softmax over neighbors (axis 1) + weighted sum, once for all lanes.
    m = jnp.max(sw, axis=1, keepdims=True)                      # (tm, 1, 3+C)
    e = jnp.exp(sw - m)                                         # (tm, K, 3+C)
    denom = jnp.sum(e, axis=1)                                  # (tm, 3+C)
    acc = jnp.sum(e * vals, axis=1)                             # (tm, 3+C)
    res = acc * pl.reciprocal(denom, approx=True)               # EUP reciprocal
    out_ref[0] = jnp.transpose(res, (1, 0))                     # (3+C, tm) lane-dense


def adapt_graph_pool_kernel(kp, kf, gp, gf, params, k_valid, tm):
    bs, Mp, _ = kp.shape
    C = kf.shape[2]
    Kp = gp.shape[2]
    grid = (bs, Mp // tm)

    def full_spec(a):
        nd = a.ndim
        return pl.BlockSpec(a.shape, lambda b, t: (0,) * nd)

    in_specs = [
        pl.BlockSpec((1, tm, 3), lambda b, t: (b, t, 0)),
        pl.BlockSpec((1, tm, C), lambda b, t: (b, t, 0)),
        pl.BlockSpec((1, tm, Kp, 3), lambda b, t: (b, t, 0, 0)),
        pl.BlockSpec((1, tm, Kp, C), lambda b, t: (b, t, 0, 0)),
    ] + [full_spec(a) for a in params]
    out_specs = pl.BlockSpec((1, 3 + C, tm), lambda b, t: (b, 0, t))
    out_shape = jax.ShapeDtypeStruct((bs, 3 + C, Mp), jnp.float32)

    vmem_limit = (64 if tm > 256 else 32) * 1024 * 1024
    kern = functools.partial(_pool_kernel, k_valid=k_valid)
    return pl.pallas_call(
        kern,
        grid=grid,
        in_specs=in_specs,
        out_specs=out_specs,
        out_shape=out_shape,
        compiler_params=pltpu.CompilerParams(
            dimension_semantics=("parallel", "parallel"),
            vmem_limit_bytes=vmem_limit),
    )(kp, kf, gp, gf, *params)


# ----------------------------------------------------------------------------
# Plain-JAX glue: FPS, gather, kNN top-k, grouping (data-dependent index ops)
# ----------------------------------------------------------------------------
def furthest_point_sample(xyz, npoint):
    """xyz: (B, N, 3) -> (B, npoint) int32 indices (deterministic, start at 0)."""
    # TODO(synk): FPS is an inherently sequential argmax chain; kept in plain JAX.
    B, N, _ = xyz.shape

    def body(i, state):
        idxs, dists, farthest = state
        idxs = idxs.at[:, i].set(farthest)
        centroid = xyz[jnp.arange(B), farthest]              # (B, 3)
        d = jnp.sum((xyz - centroid[:, None, :]) ** 2, axis=-1)
        dists = jnp.minimum(dists, d)
        farthest = jnp.argmax(dists, axis=-1).astype(jnp.int32)
        return idxs, dists, farthest

    init = (jnp.zeros((B, npoint), jnp.int32),
            jnp.full((B, N), 1e10, jnp.float32),
            jnp.zeros((B,), jnp.int32))
    idxs, _, _ = jax.lax.fori_loop(0, npoint, body, init)
    return idxs


def build_groups(vertices, feature_map, pooling_rate, neighbor_num):
    """Returns padded (kp, kf, gp, gf) in gather layout, the M tile and real M."""
    bs, _, N = vertices.shape
    M = int(N * 1.0 / pooling_rate + 0.5)
    K = neighbor_num
    tm, Mp = _choose_m_tile(M)
    Kp = max(8, _round_up(K, 8))

    vt = jnp.transpose(vertices, (0, 2, 1))       # (bs, N, 3)
    ft = jnp.transpose(feature_map, (0, 2, 1))    # (bs, N, C)

    idx = furthest_point_sample(vt, M)            # (bs, M)
    bix = jnp.arange(bs)[:, None]
    kp = vt[bix, idx]                             # (bs, M, 3)
    kf = ft[bix, idx]                             # (bs, M, C)

    # Pad the pooled-point axis so the kernels see aligned full tiles; padded
    # rows produce garbage that the caller slices off.
    if Mp != M:
        kp = jnp.pad(kp, ((0, 0), (0, Mp - M), (0, 0)))
        kf = jnp.pad(kf, ((0, 0), (0, Mp - M), (0, 0)))

    sqd = pairwise_sqdist(kp, vertices, tm)       # Pallas kernel, (bs, Mp, N) bf16
    # TODO(synk): top-k and the neighbor gather are data-dependent index ops;
    # kept in plain JAX rather than Pallas.
    _, knn_idx = jax.lax.top_k(-sqd, K)           # (bs, Mp, K) smallest distances
    if Kp != K:
        knn_idx = jnp.pad(knn_idx, ((0, 0), (0, 0), (0, Kp - K)))  # masked in-kernel

    b3 = jnp.arange(bs)[:, None, None]
    gp = vt[b3, knn_idx]                          # (bs, Mp, Kp, 3) -- gather layout
    gf = ft[b3, knn_idx]                          # (bs, Mp, Kp, C) -- no transpose
    return kp, kf, gp, gf, tm, M


def adapt_graph_pooling(vertices, feature_map, params, pooling_rate, neighbor_num):
    kp, kf, gp, gf, tm, M = build_groups(
        vertices, feature_map, pooling_rate, neighbor_num)
    fused = adapt_graph_pool_kernel(
        kp, kf, gp, gf, params, neighbor_num, tm)        # (bs, 3+C, Mp)
    # Kernel already emits the PyTorch layout (bs, 3+C, M): just split + crop.
    new_point = fused[:, :3, :M]
    new_feat = fused[:, 3:, :M]
    return new_point, new_feat


# ----------------------------------------------------------------------------
# Deterministic parameter init; BatchNorm (eval mode) folded into the conv
# weights/biases; weights stored bf16 (MXU operands), biases packed f32.
# ----------------------------------------------------------------------------
def init_params(key, in_channel, dim=64):
    C = in_channel
    eps = 1e-5
    ks = jax.random.split(key, 16)
    # pos_mlp: Conv2d(3,64,1) -> BN(64) -> LeakyReLU(0.2) -> Conv2d(64,C,1)
    W1 = 0.1 * jax.random.normal(ks[0], (64, 3), jnp.float32)
    b1 = 0.05 * jax.random.normal(ks[1], (64,), jnp.float32)
    g1 = 1.0 + 0.1 * jax.random.normal(ks[2], (64,), jnp.float32)
    be1 = 0.05 * jax.random.normal(ks[3], (64,), jnp.float32)
    rm1 = 0.02 * jax.random.normal(ks[4], (64,), jnp.float32)
    rv1 = 1.0 + 0.1 * jax.random.uniform(ks[5], (64,), jnp.float32)
    W2 = 0.1 * jax.random.normal(ks[6], (C, 64), jnp.float32)
    b2 = 0.05 * jax.random.normal(ks[7], (C,), jnp.float32)
    # attn_mlp: Conv2d(C,dim,1) -> BN(dim) -> LeakyReLU(0.2) -> Conv2d(dim,3+C,1)
    W3 = 0.1 * jax.random.normal(ks[8], (dim, C), jnp.float32)
    b3 = 0.05 * jax.random.normal(ks[9], (dim,), jnp.float32)
    g2 = 1.0 + 0.1 * jax.random.normal(ks[10], (dim,), jnp.float32)
    be2 = 0.05 * jax.random.normal(ks[11], (dim,), jnp.float32)
    rm2 = 0.02 * jax.random.normal(ks[12], (dim,), jnp.float32)
    rv2 = 1.0 + 0.1 * jax.random.uniform(ks[13], (dim,), jnp.float32)
    W4 = 0.1 * jax.random.normal(ks[14], (3 + C, dim), jnp.float32)
    b4 = 0.05 * jax.random.normal(ks[15], (3 + C,), jnp.float32)

    # Fold BN (eval): y = x*s + (beta - rm*s), s = gamma / sqrt(rv + eps)
    s1 = g1 / jnp.sqrt(rv1 + eps)
    t1 = be1 - rm1 * s1
    s2 = g2 / jnp.sqrt(rv2 + eps)
    t2 = be2 - rm2 * s2

    w1 = (W1.T * s1[None, :]).astype(jnp.bfloat16)    # (3, 64)
    b1f = b1 * s1 + t1                                # (64,)
    w2 = W2.T.astype(jnp.bfloat16)                    # (64, C)
    w3 = (W3.T * s2[None, :]).astype(jnp.bfloat16)    # (C, dim)
    b3f = b3 * s2 + t2                                # (dim,)
    w4 = W4.T.astype(jnp.bfloat16)                    # (dim, 3+C)

    dmax = max(64, C, dim, 3 + C)
    bias = jnp.zeros((4, dmax), jnp.float32)
    bias = bias.at[0, :64].set(b1f)
    bias = bias.at[1, :C].set(b2)
    bias = bias.at[2, :dim].set(b3f)
    bias = bias.at[3, :3 + C].set(b4)
    return (w1, w2, w3, w4, bias)


# ----------------------------------------------------------------------------
# Pure-JAX f32 reference for the kernel compute (correctness check)
# ----------------------------------------------------------------------------
def reference_pool(kp, kf, gp, gf, params, k_valid):
    w1, w2, w3, w4, bias = params
    w1 = w1.astype(jnp.float32)
    w2 = w2.astype(jnp.float32)
    w3 = w3.astype(jnp.float32)
    w4 = w4.astype(jnp.float32)
    d1 = w1.shape[1]
    C = w2.shape[1]
    dim = w3.shape[1]
    b1 = bias[0, :d1]
    b2 = bias[1, :C]
    b3 = bias[2, :dim]
    b4 = bias[3, :3 + C]
    pos_rel = kp[:, :, None, :] - gp            # (bs, Mp, Kp, 3)
    qk_rel = kf[:, :, None, :] - gf             # (bs, Mp, Kp, C)
    h = pos_rel @ w1 + b1
    h = jnp.where(h >= 0, h, 0.2 * h)
    pe = h @ w2 + b2
    h2 = (qk_rel + pe) @ w3 + b3
    h2 = jnp.where(h2 >= 0, h2, 0.2 * h2)
    logits = h2 @ w4 + b4                       # (bs, Mp, Kp, 3+C)
    if k_valid < gp.shape[2]:
        nb = jnp.arange(gp.shape[2])[None, None, :, None]
        logits = jnp.where(nb < k_valid, logits, -jnp.inf)
    sw = jax.nn.softmax(logits, axis=2)         # softmax over neighbors
    vals = jnp.concatenate([gp, gf + pe], axis=-1)
    return jnp.sum(sw * vals, axis=2)           # (bs, Mp, 3+C)


if __name__ == "__main__":
    key = jax.random.PRNGKey(0)
    bs, in_channel, vertice_num = 2, 16, 64
    pooling_rate, neighbor_num, dim = 2, 8, 64

    k1, k2, k3 = jax.random.split(key, 3)
    vertices = jax.random.normal(k1, (bs, 3, vertice_num), jnp.float32)
    feature_map = jax.random.normal(k2, (bs, in_channel, vertice_num), jnp.float32)
    params = init_params(k3, in_channel, dim)

    new_point, new_feat = adapt_graph_pooling(
        vertices, feature_map, params, pooling_rate, neighbor_num)
    jax.block_until_ready((new_point, new_feat))

    # Check against a pure-JAX f32 reference of the hot-path compute (same
    # grouping / kNN path). Tolerance is loose because the kernel runs bf16
    # MXU matmuls with f32 accumulation and an approximate EUP reciprocal.
    M = int(vertice_num * 1.0 / pooling_rate + 0.5)
    kp, kf, gp, gf, _, _ = build_groups(
        vertices, feature_map, pooling_rate, neighbor_num)
    ref = reference_pool(kp, kf, gp, gf, params, neighbor_num)   # (bs, Mp, 3+C)
    ref_point = jnp.transpose(ref[:, :M, :3], (0, 2, 1))
    ref_feat = jnp.transpose(ref[:, :M, 3:], (0, 2, 1))

    assert new_point.shape == (bs, 3, M)
    assert new_feat.shape == (bs, in_channel, M)
    assert bool(jnp.all(jnp.isfinite(new_point)))
    assert bool(jnp.all(jnp.isfinite(new_feat)))
    assert bool(jnp.allclose(new_point, ref_point, atol=2e-2, rtol=2e-2))
    assert bool(jnp.allclose(new_feat, ref_feat, atol=2e-2, rtol=2e-2))

    print("KERNEL_OK")
</pallas_src>

<mosaic_0001>
module attributes {stable_mosaic.version = 11 : i64} {
  func.func @_sqdist_kernel(%arg0: i32, %arg1: i32, %arg2: i32, %arg3: memref<1x32x3xf32, #tpu.memory_space<vmem>>, %arg4: memref<1x3x64xf32, #tpu.memory_space<vmem>>, %arg5: memref<1x32x64xbf16, #tpu.memory_space<vmem>>) attributes {dimension_semantics = [#tpu.dimension_semantics<parallel>, #tpu.dimension_semantics<parallel>, #tpu.dimension_semantics<parallel>], iteration_bounds = array<i64: 2, 1, 1>, scalar_prefetch = 0 : i64, scratch_operands = 0 : i64, tpu.core_type = #tpu.core_type<tc>, window_params = [{transform_indices = @transform_0, window_bounds = array<i64: 1, 32, 3>}, {transform_indices = @transform_1, window_bounds = array<i64: 1, 3, 64>}, {transform_indices = @transform_2, window_bounds = array<i64: 1, 32, 64>}]} {
    %c0 = arith.constant 0 : index
    %c0_0 = arith.constant 0 : index
    %c0_1 = arith.constant 0 : index
    %0 = vector.load %arg3[%c0, %c0_0, %c0_1] : memref<1x32x3xf32, #tpu.memory_space<vmem>>, vector<1x32x3xf32>
    %1 = vector.shape_cast %0 : vector<1x32x3xf32> to vector<32x3xf32>
    %c0_2 = arith.constant 0 : index
    %c0_3 = arith.constant 0 : index
    %c0_4 = arith.constant 0 : index
    %2 = vector.load %arg4[%c0_2, %c0_3, %c0_4] : memref<1x3x64xf32, #tpu.memory_space<vmem>>, vector<1x3x64xf32>
    %3 = vector.shape_cast %2 : vector<1x3x64xf32> to vector<3x64xf32>
    %4 = arith.mulf %1, %1 : vector<32x3xf32>
    %cst = arith.constant dense<0.000000e+00> : vector<32xf32>
    %5 = vector.multi_reduction <add>, %4, %cst [1] : vector<32x3xf32> to vector<32xf32>
    %6 = vector.shape_cast %5 : vector<32xf32> to vector<32x1xf32>
    %7 = arith.mulf %3, %3 : vector<3x64xf32>
    %cst_5 = arith.constant dense<0.000000e+00> : vector<64xf32>
    %8 = vector.multi_reduction <add>, %7, %cst_5 [0] : vector<3x64xf32> to vector<64xf32>
    %9 = vector.shape_cast %8 : vector<64xf32> to vector<1x64xf32>
    %10 = arith.truncf %1 : vector<32x3xf32> to vector<32x3xbf16>
    %11 = arith.truncf %3 : vector<3x64xf32> to vector<3x64xbf16>
    %cst_6 = arith.constant dense<0.000000e+00> : vector<32x64xf32>
    %12 = tpu.matmul %10, %11, %cst_6 {dimension_numbers = #tpu.dot_dimension_numbers<[1], [0], [0], [1], [0, 0, 1, 1], [], []>} : vector<32x3xbf16>, vector<3x64xbf16>, vector<32x64xf32> -> vector<32x64xf32>
    %cst_7 = arith.constant 2.000000e+00 : f32
    %13 = vector.broadcast %cst_7 : f32 to vector<32x64xf32>
    %14 = arith.mulf %13, %12 : vector<32x64xf32>
    %15 = vector.broadcast %6 : vector<32x1xf32> to vector<32x64xf32>
    %16 = arith.subf %15, %14 : vector<32x64xf32>
    %17 = vector.broadcast %9 : vector<1x64xf32> to vector<32x64xf32>
    %18 = arith.addf %16, %17 : vector<32x64xf32>
    %19 = arith.truncf %18 : vector<32x64xf32> to vector<32x64xbf16>
    %c0_8 = arith.constant 0 : index
    %c0_9 = arith.constant 0 : index
    %c0_10 = arith.constant 0 : index
    %20 = vector.load %arg5[%c0_8, %c0_9, %c0_10] : memref<1x32x64xbf16, #tpu.memory_space<vmem>>, vector<1x32x64xbf16>
    %21 = vector.shape_cast %20 : vector<1x32x64xbf16> to vector<32x64xbf16>
    %22 = vector.shape_cast %19 : vector<32x64xbf16> to vector<1x32x64xbf16>
    tpu.vector_store %arg5[%c0_8, %c0_9, %c0_10], %22 {strides = array<i32>} : memref<1x32x64xbf16, #tpu.memory_space<vmem>>, vector<1x32x64xbf16>,
    return
  }
  func.func @transform_0(%arg0: i32, %arg1: i32, %arg2: i32) -> (i32, i32, i32) {
    %c0_i32 = arith.constant 0 : i32
    %c0_i32_0 = arith.constant 0 : i32
    return %arg0, %arg1, %c0_i32 : i32, i32, i32
  }
  func.func @transform_1(%arg0: i32, %arg1: i32, %arg2: i32) -> (i32, i32, i32) {
    %c0_i32 = arith.constant 0 : i32
    %c0_i32_0 = arith.constant 0 : i32
    return %arg0, %c0_i32, %arg2 : i32, i32, i32
  }
  func.func @transform_2(%arg0: i32, %arg1: i32, %arg2: i32) -> (i32, i32, i32) {
    %c0_i32 = arith.constant 0 : i32
    return %arg0, %arg1, %arg2 : i32, i32, i32
  }
}

</mosaic_0001>

<bundles_post_ra>
// kernel: tpu_custom_call.1
= control target key start
LH: loop header
LB: loop body
LE: loop exit
PB: predicated region body
PF: predicated region fallthrough
CT: control target
= control target key end

     0   :  { %7 = vsyncpa [#allocation3], 0  ;;  %s779_s0 = inlined_call_operand.vmem [shape: f32[2,32,3], index: 0, kind: input, shape index: {}]   ;;  %s780_s1 = inlined_call_operand.vmem [shape: f32[2,3,64], index: 1, kind: input, shape index: {}]   ;;  %s781_s2 = inlined_call_operand.hbm [shape: bf16[2,32,64], index: 2, kind: output, shape index: {}]  }
   0x1   :  { %9 = vsyncpa [#allocation3 + $0x1], 0  ;;  %s647_s9 = smov 0   ;;  %s649_s10 = smov 0  }
   0x2   :  { %s651_s11 = smov 0   ;;  %s653_s12 = smov 0  }
   0x3   :  { %s655_s13 = smov 0   ;;  %s657_s14 = smov 0  }
   0x4 LB: > { %s455_s15 = sadd.s32 4294967295, %s626_s14   ;;  %s456_s16 = sadd.s32 4294967294, %s626_s14   ;;  %s626_s14 = sphi %s657_s14, %s15_s14   ;;  %s622_s13 = sphi %s655_s13, %s788_s13   ;;  %s618_s12 = sphi %s653_s12, %s787_s12   ;;  %s614_s11 = sphi %s651_s11, %s786_s11   ;;  %s610_s10 = sphi %s649_s10, %s785_s10   ;;  %s606_s9 = sphi %s647_s9, %s784_s9  }
   0x5   : > { %s34_s17 = sadd.s32 1, %s622_s13  ;;  %s101_s18 = sadd.s32 1, %s614_s11 }
   0x6   : > { %p36_p0 = scmp.ge.s32.totalorder %s34_s17, 2  ;;  %p111_p1 = scmp.ne.s32.totalorder %s614_s11, %s610_s10 }
   0x7   : > { %p112_p2 = scmp.eq.s32.totalorder %s455_s15, 1  ;;  %p117_p3 = scmp.ne.s32.totalorder %s610_s10, %s606_s9 }
   0x8   : > { %s790_s17 = smov (%p36_p0, %s34_s17), 0  ;;  %p118_p5 = scmp.eq.s32.totalorder %s456_s16, 1 }
   0x9   : > { %p687_p4 = por %p112_p2, %p111_p1  ;;  %s94_s20 = ssub.s32 %s622_s13, %s790_s17 }
   0xa   : > { %p459_p6 = scmp.ge.s32.totalorder %s626_s14, 1  ;;  %p99_p7 = scmp.eq.s32.totalorder %s94_s20, 0 }
   0xb   : > { %p694_p8 = por %p118_p5, %p117_p3  ;;  %p159_p9 = scmp.lt.s32.totalorder %s626_s14, 3 }
   0xc   : > { %s700_s22 = scalar_select %p99_p7, %s614_s11, %s101_s18  }
   0xd   : > { %p160_p10 = pnand %p459_p6, %p159_p9 }
   0xe   : > { %p193_p11 = scmp.lt.s32.totalorder (!%p160_p10), %s618_s12, 1  ;;  %vm251_vm0 = vcmask (!%p160_p10), 1040384   ;;  %vm252_vm1 = vcmask (!%p160_p10), 1041408   ;;  %v628_v0 = vmov (!%p160_p10), 65535   ;;  %vm220_vm2 = vcmask (!%p160_p10), 23552   ;;  %s189_s4 = sand.u32 (!%p160_p10), 1, %s610_s10  }
   0xf   : > { %163 = sbr.rel (%p160_p10) target bundleno = 273 (0x111), region = 28  ;;  %v253_v1 = vsel (!%p160_p10), %vm251_vm0, 4294967295, %v628_v0  ;;  %vm234_vm3 = vcmask (!%p160_p10), 518144   ;;  %s460_s5 = sshll.u32 (!%p160_p10), %s189_s4, 4  ;;  %vm335_vm4 = vcmask (!%p160_p10), 519168  }
  0x10   : > { %v254_v3 = vsel (!%p160_p10), %vm252_vm1, %v253_v1, 0  ;;  %s480_s6 = sshll.u32 (!%p160_p10), %s618_s12, 8  ;;  %s191_s7 = scalar_lea.vmem (!%p160_p10), [#allocation2], %s460_s5 }
  0x11   : > { %s357_s8 = sshll.u32 (!%p160_p10), %s191_s7, 4  ;;  %s724_s18 = scalar_lea.hbm (!%p160_p10), %s781_s2, %s480_s6  ;;  %s726_s8 = int_to_ptr.vmem [resolvable:$true] %s357_s8 }
  0x12   : > { %s548_s20 = scalar_lea.vmem (!%p160_p10), %s726_s8, 256 }
  0x13   : > { %p549_p12 = scmp.ne.s32.totalorder (!%p160_p10), %s726_s8, %s548_s20 }
  0x15   : > { %p550_p13 = pnand (!%p160_p10), %p549_p12, %p687_p4 }
  0x16   : > { %s194_s23 = scalar_select %p193_p11, %s618_s12, 1 }
  0x17   : > { %s733_s12 = scalar_lea.sflag [#allocation3], %s189_s4  ;;  %p551_p0 = pneg %p550_p13 }
  0x18   : > { %s463_s24 = sshll.u32 %s194_s23, 2  ;;  %s475_s25 = sshll.u32 %s194_s23, 5 }
  0x19   : > { %s208_s28 = scalar_lea.vmem %s780_s1, %s463_s24  ;;  %s200_s3 = scalar_lea.vmem %s779_s0, %s475_s25 }
  0x1a   : > { %v215_v2 = vld [vmem:[%s208_s28] sm:$0x7]  ;;  %v212_v5 = vld [vmem:[%s200_s3 + $0x8] sm:$0xff]  ;;  %v213_v8 = vld [vmem:[%s200_s3 + $0x10] sm:$0xff]  ;;  %s629_s23 = smov [#allocation2]  }
  0x1b   : > { %v211_v4 = vld [vmem:[%s200_s3] sm:$0xff]  ;;  %v244_v6 = vpack.c.bf16 %v215_v2, %v215_v2  ;;  %v214_v9 = vld [vmem:[%s200_s3 + $0x18] sm:$0xff]  ;;  %v218_v11 = vmul.f32 %v213_v8, %v213_v8  ;;  %v217_v13 = vmul.f32 %v212_v5, %v212_v5  ;;  %v233_v20 = vmul.f32 %v215_v2, %v215_v2  ;;  %s552_s24 = sshll.u32 %s629_s23, 4  ;;  %s553_s24 = int_to_ptr.vmem [resolvable:$false] %s552_s24 }
  0x1c   : > { %v242_v7 = vpack.c.bf16 %v212_v5, %v211_v4  ;;  %v216_v10 = vmul.f32 %v211_v4, %v211_v4  ;;  %v219_v12 = vmul.f32 %v214_v9, %v214_v9  ;;  %v243_v17 = vpack.c.bf16 %v214_v9, %v213_v8  ;;  %s554_s25 = scalar_lea.vmem %s553_s24, 512  ;;  %p555_p1 = scmp.lt.s32.totalorder %s726_s8, %s553_s24 }
  0x1d   : > { %v256_v14 = vand.u32 %v254_v3, %v244_v6  ;;  %v227_v16 = vsel %vm220_vm2, %v218_v11, 0.0  ;;  %v224_v18 = vsel %vm220_vm2, %v217_v13, 0.0  ;;  %v235_v21 = vsel %vm234_vm3, %v233_v20, 0.0  ;;  %p556_p2 = scmp.lt.s32.totalorder %s554_s25, %s548_s20 }
  0x1e   : > { %486 = vmatprep.mubr.msk.bf16.mxu0 %vm220_vm2, %v242_v7  ;;  %v221_v15 = vsel %vm220_vm2, %v216_v10, 0.0  ;;  %228 = vadd.xlane.f32.xlu1 %v227_v16  ;;  %v230_v19 = vsel %vm220_vm2, %v219_v12, 0.0  ;;  %v236_v22 = vrot.slane %v235_v21, 4 }
  0x1f   : > { %222 = vadd.xlane.f32.xlu0 %v221_v15  ;;  %484 = vmatprep.subr.bf16.mxu0 %v256_v14  ;;  %p557_p3 = por %p556_p2, %p555_p1 }
  0x20   : > { %485 = vmatpush3.bf16.msra.mxu0 %v256_v14  ;;  %v237_v23 = vadd.f32 %v236_v22, %v235_v21 }
  0x21   : > { %p558_p5 = pnand %p557_p3, %p551_p0 }
  0x22   : > { %231 = vadd.xlane.f32.xlu1 %v230_v19  ;;  %v238_v24 = vrot.slane %v237_v23, 2 }
  0x23   : > { %225 = vadd.xlane.f32.xlu0 %v224_v18  ;;  %487 = vmatmul.mubr.msk.bf16.vlgmr.msra.gmra.mrb[0].mxu0 %vm220_vm2, %v243_v17 }
  0x24   : > { %v239_v25 = vadd.f32 %v238_v24, %v237_v23 }
  0x26   : > { %v240_v27 = vrot.slane %v239_v25, 1 }
  0x28   : > { %v241_v30 = vadd.f32 %v240_v27, %v239_v25 }
  0xab   : > { %v229_v26 = vpop.xlane.xlu1 %228 }
  0xac   : > { %v223_v28 = vpop.xlane.xlu0 %222 }
  0xaf   : > { %v232_v35 = vpop.xlane.xlu1 %231 }
  0xb0   : > { %v226_v39 = vpop.xlane.xlu0 %225 }
  0xf6   : > { %v488_v29 = vpop.f32.mrb[0].mxu0 }
  0xf7   : > { %v309_v31 = vmul.f32 2.0, %v488_v29  ;;  %v292_v32 = vpop.f32.mrb[1].mxu0 }
  0xf8   : > { %v307_v33 = vmul.f32 2.0, %v292_v32  ;;  %v489_v34 = vpop.f32.mrb[2].mxu0 }
  0xf9   : > { %v313_v36 = vsub.f32 %v229_v26, %v309_v31  ;;  %v310_v37 = vmul.f32 2.0, %v489_v34  ;;  %v295_v38 = vpop.f32.mrb[3].mxu0 }
  0xfa   : > { %v311_v40 = vsub.f32 %v223_v28, %v307_v33  ;;  %v308_v41 = vmul.f32 2.0, %v295_v38 }
  0xfb   : > { %v317_v42 = vadd.f32 %v313_v36, %v241_v30  ;;  %v314_v43 = vsub.f32 %v232_v35, %v310_v37 }
  0xfc   : > { %v315_v44 = vadd.f32 %v311_v40, %v241_v30  ;;  %v312_v45 = vsub.f32 %v226_v39, %v308_v41 }
  0xfd   : > { %v478_v46 = vpack.c.bf16 %v317_v42, %v317_v42  ;;  %v318_v47 = vadd.f32 %v314_v43, %v241_v30 }
  0xfe   : > { %v476_v48 = vpack.c.bf16 %v315_v44, %v315_v44  ;;  %v316_v49 = vadd.f32 %v312_v45, %v241_v30 }
  0xff   : > { %338 = vst.msk [vmem:[%s191_s7 + $0x8] sm:$0xf] %vm335_vm4, %v478_v46  ;;  %v479_v50 = vpack.c.bf16 %v318_v47, %v318_v47 }
 0x100   : > { %336 = vst.msk [vmem:[%s191_s7] sm:$0xf] %vm335_vm4, %v476_v48  ;;  %v477_v51 = vpack.c.bf16 %v316_v49, %v316_v49 }
 0x101   : > { %339 = vst.msk [vmem:[%s191_s7 + $0xc] sm:$0xf] %vm335_vm4, %v479_v50 }
 0x102   : > { %337 = vst.msk [vmem:[%s191_s7 + $0x4] sm:$0xf] %vm335_vm4, %v477_v51 }
 0x103   : > { %561 = shalt.err (!%p558_p5)
}
 0x104   : > { %s562_s26 = scalar_lea.hbm %s724_s18, 256  ;;  %s566_s29 = scalar_lea.hbm %s781_s2, 512 }
 0x105   : > { %p563_p6 = scmp.ne.s32.totalorder %s724_s18, %s562_s26  ;;  %p567_p10 = scmp.lt.u32.totalorder %s724_s18, %s781_s2 }
 0x106   : > { %p568_p11 = scmp.lt.u32.totalorder %s566_s29, %s562_s26  ;;  %p570_p13 = scmp.lt.u32.totalorder %s562_s26, %s724_s18 }
 0x107   : > { %p564_p7 = pnand %p563_p6, %p687_p4 }
 0x108   : > { %p569_p12 = por %p568_p11, %p567_p10 }
 0x109   : > { %p565_p9 = pneg %p564_p7 }
 0x10a   : > { %p571_p0 = por %p570_p13, %p569_p12 }
 0x10c   : > { %p572_p1 = pnand %p571_p0, %p565_p9 }
 0x10e   : > { %575 = shalt.err (!%p572_p1)
}
 0x10f   : > { %s630_s4 = smov 64   ;;  %s631_s5 = smov 4  }
 0x110   : > { %490 = dma.vmem_to_hbm [thread:$0]  (%p687_p4), %s726_s8, 256, %s724_s18, %s733_s12, %s630_s4, %s630_s4, %s631_s5  }
 0x111 PF: > { %p496_p2 = scmp.ge.s32.totalorder %s626_s14, 2  ;;  %s372_s6 = sand.u32 1, %s606_s9  }
 0x112   : > { %s373_s7 = scalar_lea.sflag [#allocation3], %s372_s6 }
 0x113   : > { %p493_p3 = pnand %p496_p2, %p694_p8 }
 0x115   : > { %601 = dma.done.wait (!%p493_p3), %s373_s7, 256  }
 0x116   : > { %603 = vsyncadd (!%p493_p3), %s373_s7, 4294967040  ;;  %s15_s14 = sadd.s32 1, %s626_s14   ;;  %s784_s9 = smov %s610_s10 }
 0x117   : > { %p12_p5 = scmp.ge.s32.totalorder %s15_s14, 4   ;;  %s785_s10 = smov %s614_s11 }
 0x118   : > { %s786_s11 = smov %s700_s22  ;;  %s787_s12 = smov %s622_s13 }
 0x119   : > { %s788_s13 = smov %s790_s17  ;;  %14 = sbr.rel (!%p12_p5) target bundleno = 4 (0x4), region = 66 }
 0x120   :  { %378 = vsyncpa [#allocation3], 1 }
 0x121   :  { %380 = vsyncpa [#allocation3 + $0x1], 1 }

</bundles_post_ra>
